<compile_context>
chip_gen: v7x
topology: tpu7x:2x2x1
jax: 0.10.0
libtpu: 0.0.40
codegen_flags: <defaults>
</compile_context>

<pallas_src>
import functools

import jax
import jax.numpy as jnp
from jax.experimental import pallas as pl
from jax.experimental.pallas import tpu as pltpu


def _leaky_relu(h, slope=0.2):
    return jnp.where(h >= 0, h, slope * h)


def generator_kernel(x_ref,
                     w1_ref, b1_ref,
                     w2_ref, b2_ref,
                     w3_ref, b3_ref,
                     w4_ref, b4_ref,
                     o_ref):
    # Fused 4-layer MLP hot path: all matmuls + activations in one kernel.
    # MXU inputs use the weight dtype (bf16 by default); x is cast in-kernel
    # (free on the VPU).  Accumulation, bias adds and activations stay in f32.
    cdt = w1_ref.dtype

    h = jnp.dot(x_ref[...].astype(cdt), w1_ref[...],
                preferred_element_type=jnp.float32) + b1_ref[...]
    h = _leaky_relu(h)
    # dropout (eval) == identity

    h = jnp.dot(h.astype(cdt), w2_ref[...],
                preferred_element_type=jnp.float32) + b2_ref[...]
    h = _leaky_relu(h)

    h = jnp.dot(h.astype(cdt), w3_ref[...],
                preferred_element_type=jnp.float32) + b3_ref[...]
    h = _leaky_relu(h)

    h = jnp.dot(h.astype(cdt), w4_ref[...],
                preferred_element_type=jnp.float32) + b4_ref[...]
    # tanh in f32 (v5e EUP has no bf16 path); store in the output dtype.
    # TODO(synk): on v6e/v7x the epilogue could run in bf16 for extra EUP
    #             headroom, gated by chip generation.
    o_ref[...] = jnp.tanh(h).astype(o_ref.dtype)


def init_generator_params(key, in_features, out_features):
    """Deterministic PyTorch-style (Kaiming-uniform-ish) Linear init."""
    dims = [(in_features, 32), (32, 64), (64, 128), (128, out_features)]
    params = {}
    keys = jax.random.split(key, 2 * len(dims))
    for idx, (fan_in, fan_out) in enumerate(dims):
        bound = 1.0 / jnp.sqrt(float(fan_in))
        w = jax.random.uniform(keys[2 * idx], (fan_in, fan_out),
                               minval=-bound, maxval=bound, dtype=jnp.float32)
        b = jax.random.uniform(keys[2 * idx + 1], (1, fan_out),
                               minval=-bound, maxval=bound, dtype=jnp.float32)
        params[f"w{idx + 1}"] = w
        params[f"b{idx + 1}"] = b
    return params


def prepare_params(params, matmul_dtype=jnp.bfloat16):
    """One-time, off-hot-path weight prep.

    * Zero-pads fc4's output columns (weights AND bias) to a multiple of 128 so
      the kernel's output block is lane-dense (unmasked full-lane vst).  The
      padded columns evaluate to tanh(0) = 0.
    * Casts weights to the MXU input dtype (bf16 default; f32 for bit-strict).
      Biases stay f32 so bias adds / activations never see bf16 on v5e.

    Returns (prepared_param_dict, out_features).
    """
    cdt = jnp.dtype(matmul_dtype)
    fout = params["w4"].shape[1]
    fout_p = pl.cdiv(fout, 128) * 128
    w4 = jnp.pad(params["w4"], ((0, 0), (0, fout_p - fout)))
    b4 = jnp.pad(params["b4"], ((0, 0), (0, fout_p - fout)))
    prepared = {
        "w1": params["w1"].astype(cdt), "b1": params["b1"],
        "w2": params["w2"].astype(cdt), "b2": params["b2"],
        "w3": params["w3"].astype(cdt), "b3": params["b3"],
        "w4": w4.astype(cdt), "b4": b4,
    }
    return prepared, fout


def _round_up(v, m):
    return ((v + m - 1) // m) * m


@functools.partial(
    jax.jit,
    static_argnames=("out_features", "tm", "out_dtype", "slice_output"))
def generator_forward(x, prepared, *, out_features, tm=1024,
                      out_dtype=jnp.bfloat16, slice_output=True):
    """Fused Generator forward (single pallas_call on the hot path).

    x:          (batch, in_features) f32; cast to the matmul dtype in-kernel.
    prepared:   output of prepare_params() (pre-cast / pre-padded weights).
    tm:         batch-row tile (default 1024, sweep up to 2048).  The kernel is
                overhead-bound at small tiles; VMEM is never the constraint.
    out_dtype:  output store dtype (bf16 default -- halves the dominant HBM
                stream; pass jnp.float32 for bit-strict output).
    slice_output: if True, return (B, out_features); if False, return the
                padded lane-dense (B, Fout_p) array and let the consumer slice
                lazily (avoids an extra HBM round trip over the output).
    """
    B, Fin = x.shape
    Fout_p = prepared["w4"].shape[1]
    cdt = jnp.dtype(prepared["w1"].dtype)

    # Sublane packing granularity of the matmul dtype: 8 rows for 32-bit,
    # 16 for bf16, 32 for int8/fp8.
    gran = 32 // cdt.itemsize

    if B <= tm:
        tm_eff = _round_up(B, gran)
    else:
        n_steps = pl.cdiv(B, tm)
        # Even step count keeps v7x's 2 TensorCores load-balanced; harmless on
        # single-TC v5e/v6e.
        if n_steps % 2:
            n_steps += 1
        tm_eff = _round_up(pl.cdiv(B, n_steps), gran)
    grid = (pl.cdiv(B, tm_eff),)

    def full_spec(arr):
        # Whole-array block, replicated (constant index) across the batch grid
        # -> weights stay resident in VMEM across all grid steps.
        return pl.BlockSpec(arr.shape, lambda i: (0,) * arr.ndim)

    out = pl.pallas_call(
        generator_kernel,
        out_shape=jax.ShapeDtypeStruct((B, Fout_p), jnp.dtype(out_dtype)),
        grid=grid,
        in_specs=[
            pl.BlockSpec((tm_eff, Fin), lambda i: (i, 0)),
            full_spec(prepared["w1"]), full_spec(prepared["b1"]),
            full_spec(prepared["w2"]), full_spec(prepared["b2"]),
            full_spec(prepared["w3"]), full_spec(prepared["b3"]),
            full_spec(prepared["w4"]), full_spec(prepared["b4"]),
        ],
        out_specs=pl.BlockSpec((tm_eff, Fout_p), lambda i: (i, 0)),
        compiler_params=pltpu.CompilerParams(
            dimension_semantics=("parallel",)),
    )(x,
      prepared["w1"], prepared["b1"],
      prepared["w2"], prepared["b2"],
      prepared["w3"], prepared["b3"],
      prepared["w4"], prepared["b4"])

    if slice_output and Fout_p != out_features:
        out = out[:, :out_features]
    return out


def generator_reference(x, params):
    h = x @ params["w1"] + params["b1"]
    h = jnp.where(h >= 0, h, 0.2 * h)
    h = h @ params["w2"] + params["b2"]
    h = jnp.where(h >= 0, h, 0.2 * h)
    h = h @ params["w3"] + params["b3"]
    h = jnp.where(h >= 0, h, 0.2 * h)
    h = h @ params["w4"] + params["b4"]
    return jnp.tanh(h)


if __name__ == "__main__":
    key = jax.random.PRNGKey(0)
    k_param, k_x = jax.random.split(key)

    in_features, out_features = 16, 8
    batch = 2

    params = init_generator_params(k_param, in_features, out_features)
    x = jax.random.normal(k_x, (batch, in_features), dtype=jnp.float32)

    ref = generator_reference(x, params)

    # Default path: bf16 MXU inputs + bf16 output store.  Param prep is a
    # one-time call off the hot path.
    prep_bf16, fout = prepare_params(params, matmul_dtype=jnp.bfloat16)
    out_bf16 = generator_forward(x, prep_bf16, out_features=fout)
    out_bf16 = jax.block_until_ready(out_bf16)
    assert out_bf16.shape == (batch, fout)
    assert jnp.allclose(out_bf16.astype(jnp.float32), ref, atol=3e-2, rtol=0), \
        "bf16 mismatch vs reference"

    # Bit-strict f32 path (f32 MXU inputs, f32 output).
    prep_f32, _ = prepare_params(params, matmul_dtype=jnp.float32)
    out_f32 = generator_forward(x, prep_f32, out_features=fout,
                                out_dtype=jnp.float32)
    out_f32 = jax.block_until_ready(out_f32)
    assert out_f32.shape == (batch, fout)
    assert jnp.allclose(out_f32, ref, atol=1e-5, rtol=1e-5), \
        "f32 mismatch vs reference"

    print("KERNEL_OK")
</pallas_src>

<mosaic_0001>
module attributes {stable_mosaic.version = 11 : i64} {
  func.func @generator_kernel(%arg0: i32, %arg1: memref<16x16xf32, #tpu.memory_space<vmem>>, %arg2: memref<16x32xbf16, #tpu.memory_space<vmem>>, %arg3: memref<1x32xf32, #tpu.memory_space<vmem>>, %arg4: memref<32x64xbf16, #tpu.memory_space<vmem>>, %arg5: memref<1x64xf32, #tpu.memory_space<vmem>>, %arg6: memref<64x128xbf16, #tpu.memory_space<vmem>>, %arg7: memref<1x128xf32, #tpu.memory_space<vmem>>, %arg8: memref<128x128xbf16, #tpu.memory_space<vmem>>, %arg9: memref<1x128xf32, #tpu.memory_space<vmem>>, %arg10: memref<16x128xbf16, #tpu.memory_space<vmem>>) attributes {dimension_semantics = [#tpu.dimension_semantics<parallel>], iteration_bounds = array<i64: 1>, scalar_prefetch = 0 : i64, scratch_operands = 0 : i64, tpu.core_type = #tpu.core_type<tc>, window_params = [{transform_indices = @transform_0, window_bounds = array<i64: 16, 16>}, {pipeline_mode = #tpu.pipeline_mode<synchronous>, transform_indices = @transform_1, window_bounds = array<i64: 16, 32>}, {pipeline_mode = #tpu.pipeline_mode<synchronous>, transform_indices = @transform_2, window_bounds = array<i64: 1, 32>}, {pipeline_mode = #tpu.pipeline_mode<synchronous>, transform_indices = @transform_3, window_bounds = array<i64: 32, 64>}, {pipeline_mode = #tpu.pipeline_mode<synchronous>, transform_indices = @transform_4, window_bounds = array<i64: 1, 64>}, {pipeline_mode = #tpu.pipeline_mode<synchronous>, transform_indices = @transform_5, window_bounds = array<i64: 64, 128>}, {pipeline_mode = #tpu.pipeline_mode<synchronous>, transform_indices = @transform_6, window_bounds = array<i64: 1, 128>}, {pipeline_mode = #tpu.pipeline_mode<synchronous>, transform_indices = @transform_7, window_bounds = array<i64: 128, 128>}, {pipeline_mode = #tpu.pipeline_mode<synchronous>, transform_indices = @transform_8, window_bounds = array<i64: 1, 128>}, {transform_indices = @transform_9, window_bounds = array<i64: 16, 128>}]} {
    %c0 = arith.constant 0 : index
    %c0_0 = arith.constant 0 : index
    %0 = vector.load %arg1[%c0, %c0_0] : memref<16x16xf32, #tpu.memory_space<vmem>>, vector<16x16xf32>
    %1 = arith.truncf %0 : vector<16x16xf32> to vector<16x16xbf16>
    %c0_1 = arith.constant 0 : index
    %c0_2 = arith.constant 0 : index
    %2 = vector.load %arg2[%c0_1, %c0_2] : memref<16x32xbf16, #tpu.memory_space<vmem>>, vector<16x32xbf16>
    %cst = arith.constant dense<0.000000e+00> : vector<16x32xf32>
    %3 = tpu.matmul %1, %2, %cst {dimension_numbers = #tpu.dot_dimension_numbers<[1], [0], [0], [1], [0, 0, 1, 1], [], []>} : vector<16x16xbf16>, vector<16x32xbf16>, vector<16x32xf32> -> vector<16x32xf32>
    %c0_3 = arith.constant 0 : index
    %c0_4 = arith.constant 0 : index
    %4 = vector.load %arg3[%c0_3, %c0_4] : memref<1x32xf32, #tpu.memory_space<vmem>>, vector<1x32xf32>
    %5 = vector.broadcast %4 : vector<1x32xf32> to vector<16x32xf32>
    %6 = arith.addf %3, %5 : vector<16x32xf32>
    %cst_5 = arith.constant 0.000000e+00 : f32
    %7 = vector.broadcast %cst_5 : f32 to vector<16x32xf32>
    %8 = arith.cmpf oge, %6, %7 : vector<16x32xf32>
    %cst_6 = arith.constant 2.000000e-01 : f32
    %9 = vector.broadcast %cst_6 : f32 to vector<16x32xf32>
    %10 = arith.mulf %9, %6 : vector<16x32xf32>
    %11 = arith.select %8, %6, %10 : vector<16x32xi1>, vector<16x32xf32>
    %12 = arith.truncf %11 : vector<16x32xf32> to vector<16x32xbf16>
    %c0_7 = arith.constant 0 : index
    %c0_8 = arith.constant 0 : index
    %13 = vector.load %arg4[%c0_7, %c0_8] : memref<32x64xbf16, #tpu.memory_space<vmem>>, vector<32x64xbf16>
    %cst_9 = arith.constant dense<0.000000e+00> : vector<16x64xf32>
    %14 = tpu.matmul %12, %13, %cst_9 {dimension_numbers = #tpu.dot_dimension_numbers<[1], [0], [0], [1], [0, 0, 1, 1], [], []>} : vector<16x32xbf16>, vector<32x64xbf16>, vector<16x64xf32> -> vector<16x64xf32>
    %c0_10 = arith.constant 0 : index
    %c0_11 = arith.constant 0 : index
    %15 = vector.load %arg5[%c0_10, %c0_11] : memref<1x64xf32, #tpu.memory_space<vmem>>, vector<1x64xf32>
    %16 = vector.broadcast %15 : vector<1x64xf32> to vector<16x64xf32>
    %17 = arith.addf %14, %16 : vector<16x64xf32>
    %cst_12 = arith.constant 0.000000e+00 : f32
    %18 = vector.broadcast %cst_12 : f32 to vector<16x64xf32>
    %19 = arith.cmpf oge, %17, %18 : vector<16x64xf32>
    %cst_13 = arith.constant 2.000000e-01 : f32
    %20 = vector.broadcast %cst_13 : f32 to vector<16x64xf32>
    %21 = arith.mulf %20, %17 : vector<16x64xf32>
    %22 = arith.select %19, %17, %21 : vector<16x64xi1>, vector<16x64xf32>
    %23 = arith.truncf %22 : vector<16x64xf32> to vector<16x64xbf16>
    %c0_14 = arith.constant 0 : index
    %c0_15 = arith.constant 0 : index
    %24 = vector.load %arg6[%c0_14, %c0_15] : memref<64x128xbf16, #tpu.memory_space<vmem>>, vector<64x128xbf16>
    %cst_16 = arith.constant dense<0.000000e+00> : vector<16x128xf32>
    %25 = tpu.matmul %23, %24, %cst_16 {dimension_numbers = #tpu.dot_dimension_numbers<[1], [0], [0], [1], [0, 0, 1, 1], [], []>} : vector<16x64xbf16>, vector<64x128xbf16>, vector<16x128xf32> -> vector<16x128xf32>
    %c0_17 = arith.constant 0 : index
    %c0_18 = arith.constant 0 : index
    %26 = vector.load %arg7[%c0_17, %c0_18] : memref<1x128xf32, #tpu.memory_space<vmem>>, vector<1x128xf32>
    %27 = vector.broadcast %26 : vector<1x128xf32> to vector<16x128xf32>
    %28 = arith.addf %25, %27 : vector<16x128xf32>
    %cst_19 = arith.constant 0.000000e+00 : f32
    %29 = vector.broadcast %cst_19 : f32 to vector<16x128xf32>
    %30 = arith.cmpf oge, %28, %29 : vector<16x128xf32>
    %cst_20 = arith.constant 2.000000e-01 : f32
    %31 = vector.broadcast %cst_20 : f32 to vector<16x128xf32>
    %32 = arith.mulf %31, %28 : vector<16x128xf32>
    %33 = arith.select %30, %28, %32 : vector<16x128xi1>, vector<16x128xf32>
    %34 = arith.truncf %33 : vector<16x128xf32> to vector<16x128xbf16>
    %c0_21 = arith.constant 0 : index
    %c0_22 = arith.constant 0 : index
    %35 = vector.load %arg8[%c0_21, %c0_22] : memref<128x128xbf16, #tpu.memory_space<vmem>>, vector<128x128xbf16>
    %cst_23 = arith.constant dense<0.000000e+00> : vector<16x128xf32>
    %36 = tpu.matmul %34, %35, %cst_23 {dimension_numbers = #tpu.dot_dimension_numbers<[1], [0], [0], [1], [0, 0, 1, 1], [], []>} : vector<16x128xbf16>, vector<128x128xbf16>, vector<16x128xf32> -> vector<16x128xf32>
    %c0_24 = arith.constant 0 : index
    %c0_25 = arith.constant 0 : index
    %37 = vector.load %arg9[%c0_24, %c0_25] : memref<1x128xf32, #tpu.memory_space<vmem>>, vector<1x128xf32>
    %38 = vector.broadcast %37 : vector<1x128xf32> to vector<16x128xf32>
    %39 = arith.addf %36, %38 : vector<16x128xf32>
    %40 = math.tanh %39 : vector<16x128xf32>
    %41 = arith.truncf %40 : vector<16x128xf32> to vector<16x128xbf16>
    %c0_26 = arith.constant 0 : index
    %c0_27 = arith.constant 0 : index
    %42 = vector.load %arg10[%c0_26, %c0_27] : memref<16x128xbf16, #tpu.memory_space<vmem>>, vector<16x128xbf16>
    tpu.vector_store %arg10[%c0_26, %c0_27], %41 {strides = array<i32>} : memref<16x128xbf16, #tpu.memory_space<vmem>>, vector<16x128xbf16>,
    return
  }
  func.func @transform_0(%arg0: i32) -> (i32, i32) {
    %c0_i32 = arith.constant 0 : i32
    %c0_i32_0 = arith.constant 0 : i32
    return %arg0, %c0_i32 : i32, i32
  }
  func.func @transform_1(%arg0: i32) -> (i32, i32) {
    %c0_i32 = arith.constant 0 : i32
    %c0_i32_0 = arith.constant 0 : i32
    %c0_i32_1 = arith.constant 0 : i32
    return %c0_i32, %c0_i32_0 : i32, i32
  }
  func.func @transform_2(%arg0: i32) -> (i32, i32) {
    %c0_i32 = arith.constant 0 : i32
    %c0_i32_0 = arith.constant 0 : i32
    %c0_i32_1 = arith.constant 0 : i32
    return %c0_i32, %c0_i32_0 : i32, i32
  }
  func.func @transform_3(%arg0: i32) -> (i32, i32) {
    %c0_i32 = arith.constant 0 : i32
    %c0_i32_0 = arith.constant 0 : i32
    %c0_i32_1 = arith.constant 0 : i32
    return %c0_i32, %c0_i32_0 : i32, i32
  }
  func.func @transform_4(%arg0: i32) -> (i32, i32) {
    %c0_i32 = arith.constant 0 : i32
    %c0_i32_0 = arith.constant 0 : i32
    %c0_i32_1 = arith.constant 0 : i32
    return %c0_i32, %c0_i32_0 : i32, i32
  }
  func.func @transform_5(%arg0: i32) -> (i32, i32) {
    %c0_i32 = arith.constant 0 : i32
    %c0_i32_0 = arith.constant 0 : i32
    %c0_i32_1 = arith.constant 0 : i32
    return %c0_i32, %c0_i32_0 : i32, i32
  }
  func.func @transform_6(%arg0: i32) -> (i32, i32) {
    %c0_i32 = arith.constant 0 : i32
    %c0_i32_0 = arith.constant 0 : i32
    %c0_i32_1 = arith.constant 0 : i32
    return %c0_i32, %c0_i32_0 : i32, i32
  }
  func.func @transform_7(%arg0: i32) -> (i32, i32) {
    %c0_i32 = arith.constant 0 : i32
    %c0_i32_0 = arith.constant 0 : i32
    %c0_i32_1 = arith.constant 0 : i32
    return %c0_i32, %c0_i32_0 : i32, i32
  }
  func.func @transform_8(%arg0: i32) -> (i32, i32) {
    %c0_i32 = arith.constant 0 : i32
    %c0_i32_0 = arith.constant 0 : i32
    %c0_i32_1 = arith.constant 0 : i32
    return %c0_i32, %c0_i32_0 : i32, i32
  }
  func.func @transform_9(%arg0: i32) -> (i32, i32) {
    %c0_i32 = arith.constant 0 : i32
    %c0_i32_0 = arith.constant 0 : i32
    return %arg0, %c0_i32 : i32, i32
  }
}

</mosaic_0001>

<bundles_post_ra>
// kernel: generator_forward.1
= control target key start
LH: loop header
LB: loop body
LE: loop exit
PB: predicated region body
PF: predicated region fallthrough
CT: control target
= control target key end

     0   :  { %14 = vsyncpa [#allocation3], 0  ;;  %s949_s0 = inlined_call_operand.hbm [shape: f32[2,16], index: 0, kind: input, shape index: {}]   ;;  %s950_s1 = inlined_call_operand.hbm [shape: bf16[16,32], index: 1, kind: input, shape index: {}]   ;;  %s951_s2 = inlined_call_operand.vmem [shape: f32[1,32], index: 2, kind: input, shape index: {}]   ;;  %s952_s3 = inlined_call_operand.vmem [shape: bf16[32,64], index: 3, kind: input, shape index: {}]   ;;  %s953_s4 = inlined_call_operand.vmem [shape: f32[1,64], index: 4, kind: input, shape index: {}]   ;;  %s954_s5 = inlined_call_operand.hbm [shape: bf16[64,128], index: 5, kind: input, shape index: {}]   ;;  %s955_s6 = inlined_call_operand.vmem [shape: f32[1,128], index: 6, kind: input, shape index: {}]   ;;  %s956_s7 = inlined_call_operand.hbm [shape: bf16[128,128], index: 7, kind: input, shape index: {}]   ;;  %s957_s8 = inlined_call_operand.vmem [shape: f32[1,128], index: 8, kind: input, shape index: {}]   ;;  %s958_s9 = inlined_call_operand.hbm [shape: bf16[2,128], index: 9, kind: output, shape index: {}]  }
   0x1   :  { %15 = vsyncpa [#allocation6], 0 }
   0x2   :  { %16 = vsyncpa [#allocation9], 0 }
   0x3   :  { %17 = vsyncpa [#allocation4], 0 }
   0x4   :  { %22 = vsyncadd [#allocation3], 224  ;;  %s768_s30 = smov [#allocation5]   ;;  %s650_s13 = scalar_lea.hbm %s950_s1, 128 }
   0x5   :  { %s35_s10 = sshll.u32 %s768_s30, 4  ;;  %p651_p0 = scmp.ne.s32.totalorder %s950_s1, %s650_s13  ;;  %s36_s10 = int_to_ptr.vmem [resolvable:$true] %s35_s10 }
   0x6   :  { %p654_p1 = scmp.lt.u32.totalorder %s650_s13, %s950_s1 }
   0x8   :  { %p656_p2 = pnand %p654_p1, %p651_p0 }
   0xa   :  { %659 = shalt.err (!%p656_p2)
}
   0xb   :  { %s660_s18 = scalar_lea.vmem %s36_s10, 128  ;;  %p665_p4 = scmp.lt.s32.totalorder %s36_s10, %s36_s10 }
   0xc   :  { %p661_p3 = scmp.ne.s32.totalorder %s36_s10, %s660_s18  ;;  %p666_p5 = scmp.lt.s32.totalorder %s660_s18, %s660_s18 }
   0xe   :  { %p667_p6 = por %p666_p5, %p665_p4 }
  0x10   :  { %p668_p7 = pnand %p667_p6, %p661_p3 }
  0x12   :  { %671 = shalt.err (!%p668_p7)
}
  0x13   :  { %s769_s19 = smov 64   ;;  %s770_s20 = smov 4  }
  0x14   :  { %41 = dma.hbm_to_vmem [thread:$0]  %s950_s1, 128, %s36_s10, [#allocation6], %s769_s19, %s769_s19, %s770_s20  }
  0x15   :  { %s771_s23 = smov [#allocation2]   ;;  %s672_s27 = scalar_lea.hbm %s949_s0, 32 }
  0x16   :  { %s23_s24 = sshll.u32 %s771_s23, 4  ;;  %p673_p8 = scmp.ne.s32.totalorder %s949_s0, %s672_s27  ;;  %s24_s24 = int_to_ptr.vmem [resolvable:$true] %s23_s24 }
  0x17   :  { %p676_p9 = scmp.lt.u32.totalorder %s672_s27, %s949_s0 }
  0x19   :  { %p678_p10 = pnand %p676_p9, %p673_p8 }
  0x1b   :  { %681 = shalt.err (!%p678_p10)
}
  0x1c   :  { %s682_s12 = scalar_lea.vmem %s24_s24, 32  ;;  %s686_s1 = scalar_lea.vmem %s24_s24, 256 }
  0x1d   :  { %p683_p11 = scmp.ne.s32.totalorder %s24_s24, %s682_s12  ;;  %p687_p12 = scmp.lt.s32.totalorder %s24_s24, %s24_s24 }
  0x1e   :  { %p688_p13 = scmp.lt.s32.totalorder %s686_s1, %s682_s12 }
  0x20   :  { %p689_p0 = por %p688_p13, %p687_p12 }
  0x22   :  { %p690_p1 = pnand %p689_p0, %p683_p11 }
  0x24   :  { %693 = shalt.err (!%p690_p1)
}
  0x25   :  { %s772_s10 = smov 32   ;;  %s773_s13 = smov 2  }
  0x26   :  { %29 = dma.hbm_to_vmem [thread:$0]  %s949_s0, 32, %s24_s24, [#allocation3], %s772_s10, %s772_s10, %s773_s13  }
  0x27   :  { %s774_s16 = smov [#allocation7]   ;;  %s775_s18 = smov [#allocation8]  }
  0x28   :  { %s53_s17 = sshll.u32 %s774_s16, 4  ;;  %s67_s21 = sshll.u32 %s775_s18, 4  ;;  %s54_s17 = int_to_ptr.vmem [resolvable:$true] %s53_s17  ;;  %s859_s21 = int_to_ptr.vmem [resolvable:$true] %s67_s21 }
  0x29   :  { %s694_s25 = scalar_lea.hbm %s954_s5, 512 }
  0x2a   :  { %p695_p2 = scmp.ne.s32.totalorder %s954_s5, %s694_s25  ;;  %p698_p3 = scmp.lt.u32.totalorder %s694_s25, %s954_s5 }
  0x2c   :  { %p700_p4 = pnand %p698_p3, %p695_p2 }
  0x2e   :  { %703 = shalt.err (!%p700_p4)
}
  0x2f   :  { %s704_s0 = scalar_lea.vmem %s54_s17, 512  ;;  %p709_p6 = scmp.lt.s32.totalorder %s54_s17, %s54_s17 }
  0x30   :  { %p705_p5 = scmp.ne.s32.totalorder %s54_s17, %s704_s0  ;;  %p710_p7 = scmp.lt.s32.totalorder %s704_s0, %s704_s0 }
  0x32   :  { %p711_p8 = por %p710_p7, %p709_p6 }
  0x34   :  { %p712_p9 = pnand %p711_p8, %p705_p5 }
  0x36   :  { %715 = shalt.err (!%p712_p9)
}
  0x37   :  { %59 = dma.hbm_to_vmem [thread:$0]  %s954_s5, 512, %s54_s17, [#allocation6], %s769_s19, %s769_s19, %s770_s20  }
  0x38   :  { %s716_s1 = scalar_lea.hbm %s956_s7, 1024 }
  0x39   :  { %p717_p10 = scmp.ne.s32.totalorder %s956_s7, %s716_s1  ;;  %p720_p11 = scmp.lt.u32.totalorder %s716_s1, %s956_s7 }
  0x3b   :  { %p722_p12 = pnand %p720_p11, %p717_p10 }
  0x3d   :  { %725 = shalt.err (!%p722_p12)
}
  0x3e   :  { %s726_s16 = scalar_lea.vmem %s859_s21, 1024  ;;  %p731_p0 = scmp.lt.s32.totalorder %s859_s21, %s859_s21 }
  0x3f   :  { %p727_p13 = scmp.ne.s32.totalorder %s859_s21, %s726_s16  ;;  %p732_p1 = scmp.lt.s32.totalorder %s726_s16, %s726_s16 }
  0x41   :  { %p733_p2 = por %p732_p1, %p731_p0 }
  0x43   :  { %p734_p3 = pnand %p733_p2, %p727_p13 }
  0x45   :  { %737 = shalt.err (!%p734_p3)
}
  0x46   :  { %73 = dma.hbm_to_vmem [thread:$0]  %s956_s7, 1024, %s859_s21, [#allocation9], %s769_s19, %s769_s19, %s770_s20  }
  0x47   :  { %760 = dma.done.wait [#allocation3], 256  }
  0x48   :  { %761 = vsyncadd [#allocation3], 4294967040 }
  0x49   :  { %762 = dma.done.wait [#allocation6], 640  }
  0x4a   :  { %763 = vsyncadd [#allocation6], 4294966656 }
  0x4b   :  { %764 = dma.done.wait [#allocation9], 1024  }
  0x4c   :  { %765 = vsyncadd [#allocation9], 4294966272  ;;  %v776_v0 = vmov 0.0   ;;  %vm777_vm0 = vmmov 0   ;;  %v631_v1 = vld [vmem:[#allocation5] sm:$0xff]   ;;  %v89_v2 = vld [vmem:[#allocation2] sm:$0xff] }
  0x4d   :  { %571 = vmatprep.subr.bf16.mxu0 %v776_v0  ;;  %573 = vmatprep.mubr.msk.bf16.mxu0 %vm777_vm0, %v776_v0  ;;  %v90_v3 = vld [vmem:[#allocation2 + $0x8] sm:$0xff]  ;;  %vm107_vm1 = vcmask 130048   ;;  %v632_v5 = vld [vmem:[%s952_s3] sm:$0xff]   ;;  %v633_v6 = vld [vmem:[%s952_s3 + $0x8] sm:$0xff]   ;;  %vm182_vm4 = vcmask 261120   ;;  %vm273_vm7 = vcmask 523264  }
  0x4e   :  { %597 = vmatprep.subr.bf16.mxu1 %v776_v0  ;;  %613 = vmatprep.mubr.msk.bf16.mxu1 %vm777_vm0, %v776_v0  ;;  %v91_v4 = vpack.c.bf16 %v90_v3, %v89_v2  ;;  %v525_v7 = vld [vmem:[%s951_s2] ss:$0 sm:$0xff]  ;;  %v634_v18 = vld [vmem:[#allocation7] sm:$0xff]   ;;  %v635_v20 = vld [vmem:[#allocation7 + $0x8] sm:$0xff]   ;;  %v778_v62 = vmov 1966171168  }
  0x4f   :  { %572 = vmatpush3.bf16.msra.mxu0 %v631_v1  ;;  %v636_v21 = vld [vmem:[#allocation7 + $0x10] sm:$0xff]   ;;  %v637_v22 = vld [vmem:[#allocation7 + $0x18] sm:$0xff]   ;;  %v638_v23 = vld [vmem:[#allocation8] sm:$0xff]   ;;  %v443_v63 = vunpack.c.l.s4 %v778_v62 }
  0x50   :  { %577 = vmatprep.subr.bf16.mxu0 %v776_v0  ;;  %598 = vmatpush3.bf16.msra.mxu1 %v638_v23  ;;  %v639_v24 = vld [vmem:[#allocation8 + $0x8] sm:$0xff]   ;;  %v640_v25 = vld [vmem:[#allocation8 + $0x10] sm:$0xff]   ;;  %v641_v26 = vld [vmem:[#allocation8 + $0x18] sm:$0xff]  }
  0x51   :  { %599 = vmatprep.subr.bf16.mxu1 %v776_v0  ;;  %v642_v27 = vld [vmem:[#allocation8 + $0x20] sm:$0xff]   ;;  %v643_v28 = vld [vmem:[#allocation8 + $0x28] sm:$0xff]   ;;  %v528_v29 = vld [vmem:[%s953_s4] ss:$0 sm:$0xff]  ;;  %v444_v1 = vunpack.c.0.s8 %v443_v63 }
  0x52   :  { %574 = vmatmul.mubr.msk.bf16.vlgmr.msra.gmra.mrb[0].mxu0 %vm107_vm1, %v91_v4  ;;  %v644_v41 = vld [vmem:[#allocation8 + $0x30] sm:$0xff]   ;;  %v645_v42 = vld [vmem:[#allocation8 + $0x38] sm:$0xff]  }
  0x53   :  { %581 = vmatprep.mubr.msk.bf16.mxu0 %vm777_vm0, %v776_v0  ;;  %578 = vmatpush3.bf16.msra.mxu0 %v632_v5  ;;  %v532_v43 = vld [vmem:[%s955_s6] ss:$0 sm:$0xff] }
  0x54   :  { %579 = vmatprep.subr.bf16.mxu0 %v776_v0  ;;  %600 = vmatpush3.bf16.msra.mxu1 %v639_v24  ;;  %v538_v55 = vld [vmem:[%s957_s8] ss:$0 sm:$0xff] }
  0x55   :  { %601 = vmatprep.subr.bf16.mxu1 %v776_v0 }
  0x57   :  { %580 = vmatpush3.bf16.msra.mxu0 %v633_v6 }
  0x58   :  { %585 = vmatprep.subr.bf16.mxu0 %v776_v0  ;;  %602 = vmatpush3.bf16.msra.mxu1 %v640_v25 }
  0x59   :  { %603 = vmatprep.subr.bf16.mxu1 %v776_v0 }
  0x5c   :  { %604 = vmatpush3.bf16.msra.mxu1 %v641_v26 }
  0x5d   :  { %605 = vmatprep.subr.bf16.mxu1 %v776_v0 }
  0x60   :  { %606 = vmatpush3.bf16.msra.mxu1 %v642_v27 }
  0x61   :  { %607 = vmatprep.subr.bf16.mxu1 %v776_v0 }
  0x64   :  { %608 = vmatpush3.bf16.msra.mxu1 %v643_v28 }
  0x65   :  { %609 = vmatprep.subr.bf16.mxu1 %v776_v0 }
  0x68   :  { %610 = vmatpush3.bf16.msra.mxu1 %v644_v41 }
  0x69   :  { %611 = vmatprep.subr.bf16.mxu1 %v776_v0 }
  0x6c   :  { %612 = vmatpush3.bf16.msra.mxu1 %v645_v42 }
 0x125   :  { %v145_v8 = vpop.f32.mrb[0].mxu0 }
 0x126   :  { %v146_v9 = vadd.f32 %v525_v7, %v145_v8  ;;  %v575_v10 = vpop.f32.mrb[1].mxu0 }
 0x127   :  { %v148_v11 = vpop.f32.mrb[2].mxu0 }
 0x128   :  { %v154_v12 = vmul.f32 0.2, %v146_v9  ;;  %v149_v13 = vadd.f32 %v525_v7, %v148_v11  ;;  %v576_v14 = vpop.f32.mrb[3].mxu0  ;;  %vm152_vm2 = vcmp.ge.f32.partialorder %v146_v9, 0.0 }
 0x12a   :  { %vm153_vm3 = vcmp.ge.f32.partialorder %v149_v13, 0.0  ;;  %v155_v15 = vmul.f32 0.2, %v149_v13  ;;  %v156_v16 = vsel %vm152_vm2, %v146_v9, %v154_v12 }
 0x12c   :  { %v157_v17 = vsel %vm153_vm3, %v149_v13, %v155_v15 }
 0x12d   :  { %v158_v19 = vpack.c.bf16 %v157_v17, %v156_v16 }
 0x12f   :  { %582 = vmatmul.mubr.msk.bf16.vlgmr.msra.gmra.mrb[4].mxu0 %vm182_vm4, %v158_v19 }
 0x130   :  { %586 = vmatpush3.bf16.msra.mxu0 %v634_v18  ;;  %593 = vmatprep.mubr.msk.bf16.mxu0 %vm777_vm0, %v776_v0 }
 0x131   :  { %587 = vmatprep.subr.bf16.mxu0 %v776_v0 }
 0x134   :  { %588 = vmatpush3.bf16.msra.mxu0 %v635_v20 }
 0x135   :  { %589 = vmatprep.subr.bf16.mxu0 %v776_v0 }
 0x138   :  { %590 = vmatpush3.bf16.msra.mxu0 %v636_v21 }
 0x139   :  { %591 = vmatprep.subr.bf16.mxu0 %v776_v0  ;;  %v445_v0 = vlaneseq }
 0x13b   :  { %v446_v2 = vshrl.u32 %v445_v0, 7 }
 0x13c   :  { %592 = vmatpush3.bf16.msra.mxu0 %v637_v22 }
 0x13d   :  { %v447_v4 = vsub.s32 %v444_v1, %v446_v2 }
 0x202   :  { %v220_v30 = vpop.f32.mrb[4].mxu0 }
 0x203   :  { %v221_v31 = vadd.f32 %v528_v29, %v220_v30  ;;  %v583_v32 = vpop.f32.mrb[5].mxu0 }
 0x204   :  { %v223_v33 = vpop.f32.mrb[6].mxu0 }
 0x205   :  { %v229_v34 = vmul.f32 0.2, %v221_v31  ;;  %v224_v35 = vadd.f32 %v528_v29, %v223_v33  ;;  %v584_v36 = vpop.f32.mrb[7].mxu0  ;;  %vm227_vm5 = vcmp.ge.f32.partialorder %v221_v31, 0.0 }
 0x207   :  { %vm228_vm6 = vcmp.ge.f32.partialorder %v224_v35, 0.0  ;;  %v230_v37 = vmul.f32 0.2, %v224_v35  ;;  %v231_v38 = vsel %vm227_vm5, %v221_v31, %v229_v34 }
 0x209   :  { %v232_v39 = vsel %vm228_vm6, %v224_v35, %v230_v37 }
 0x20a   :  { %v233_v40 = vpack.c.bf16 %v232_v39, %v231_v38 }
 0x20c   :  { %594 = vmatmul.mubr.msk.bf16.vlgmr.msra.gmra.mrb[8].mxu0 %vm273_vm7, %v233_v40 }
 0x2df   :  { %v311_v44 = vpop.f32.mrb[8].mxu0 }
 0x2e0   :  { %v312_v45 = vadd.f32 %v532_v43, %v311_v44  ;;  %v595_v46 = vpop.f32.mrb[9].mxu0 }
 0x2e1   :  { %v314_v47 = vpop.f32.mrb[10].mxu0 }
 0x2e2   :  { %v320_v48 = vmul.f32 0.2, %v312_v45  ;;  %v315_v49 = vadd.f32 %v532_v43, %v314_v47  ;;  %v596_v50 = vpop.f32.mrb[11].mxu0  ;;  %vm318_vm8 = vcmp.ge.f32.partialorder %v312_v45, 0.0 }
 0x2e4   :  { %vm319_vm9 = vcmp.ge.f32.partialorder %v315_v49, 0.0  ;;  %v321_v51 = vmul.f32 0.2, %v315_v49  ;;  %v322_v52 = vsel %vm318_vm8, %v312_v45, %v320_v48 }
 0x2e6   :  { %v323_v53 = vsel %vm319_vm9, %v315_v49, %v321_v51 }
 0x2e7   :  { %v324_v54 = vpack.c.bf16 %v323_v53, %v322_v52 }
 0x2e9   :  { %614 = vmatmul.mubr.bf16.vlgmr.msra.gmra.mrb[0].mxu1 %v324_v54 }
 0x3bc   :  { %v430_v56 = vpop.f32.mrb[0].mxu1 }
 0x3bd   :  { %v431_v57 = vadd.f32 %v538_v55, %v430_v56  ;;  %v615_v58 = vpop.f32.mrb[1].mxu1 }
 0x3be   :  { %v433_v59 = vpop.f32.mrb[2].mxu1 }
 0x3bf   :  { %v434_v60 = vadd.f32 %v538_v55, %v433_v59  ;;  %v616_v61 = vpop.f32.mrb[3].mxu1  ;;  %646 = vtanh.f32 %v431_v57 }
 0x3c1   :  { %648 = vtanh.f32 %v434_v60 }
 0x3c9   :  { %v647_v3 = vpop.eup %646 }
 0x3cb   :  { %v649_v5 = vpop.eup %648 }
 0x3cc   :  { %v439_v6 = vpack.c.bf16 %v649_v5, %v647_v3  ;;  %v547_v7 = vpack.c.bf16 %v649_v5, %v649_v5 }
 0x3ce   :  { %v448_v8 = vrot.slane %v439_v6, %v447_v4  ;;  %v455_v9 = vrot.slane %v547_v7, %v447_v4 }
 0x3d0   :  { %v456_v10 = vcombine.high %v448_v8, %v448_v8  ;;  %v457_v11 = vcombine.high %v455_v9, %v455_v9  ;;  %v464_v12 = vrot.slane %v448_v8, %v447_v4  ;;  %v471_v13 = vrot.slane %v455_v9, %v447_v4  ;;  %548 = vst.sshfl [vmem:[#allocation10] sm:$0x1 pattern:$0x73625140] %v448_v8 }
 0x3d1   :  { %550 = vst.sshfl [vmem:[#allocation10 + $0x4] sm:$0x1 pattern:$0x73625140] %v455_v9 }
 0x3d2   :  { %v478_v14 = vrot.slane %v456_v10, %v447_v4  ;;  %v485_v15 = vrot.slane %v457_v11, %v447_v4  ;;  %v486_v16 = vcombine.high %v464_v12, %v464_v12  ;;  %v487_v17 = vcombine.high %v471_v13, %v471_v13  ;;  %549 = vst.sshfl [vmem:[#allocation10 + $0x1] sm:$0x1 pattern:$0x73625140] %v456_v10 }
 0x3d3   :  { %551 = vst.sshfl [vmem:[#allocation10 + $0x5] sm:$0x1 pattern:$0x73625140] %v457_v11 }
 0x3d4   :  { %v488_v18 = vcombine.high %v478_v14, %v478_v14  ;;  %v489_v19 = vcombine.high %v485_v15, %v485_v15  ;;  %500 = vst [vmem:[#allocation10 + $0x2] sm:$0x1] %v486_v16  ;;  %504 = vst [vmem:[#allocation10 + $0x6] sm:$0x1] %v487_v17 }
 0x3d6   :  { %501 = vst [vmem:[#allocation10 + $0x3] sm:$0x1] %v488_v18  ;;  %505 = vst [vmem:[#allocation10 + $0x7] sm:$0x1] %v489_v19 }
 0x3d7   :  { %510 = vsyncadd [#allocation4], 112  ;;  %s779_s6 = smov [#allocation10]  }
 0x3d8   :  { %s511_s8 = sshll.u32 %s779_s6, 4  ;;  %s512_s8 = int_to_ptr.vmem [resolvable:$true] %s511_s8 }
 0x3d9   :  { %s738_s27 = scalar_lea.vmem %s512_s8, 16  ;;  %s742_s28 = scalar_lea.vmem %s512_s8, 128 }
 0x3da   :  { %p739_p4 = scmp.ne.s32.totalorder %s512_s8, %s738_s27  ;;  %p743_p5 = scmp.lt.s32.totalorder %s512_s8, %s512_s8 }
 0x3db   :  { %p744_p6 = scmp.lt.s32.totalorder %s742_s28, %s738_s27 }
 0x3dd   :  { %p745_p7 = por %p744_p6, %p743_p5 }
 0x3df   :  { %p746_p8 = pnand %p745_p7, %p739_p4 }
 0x3e1   :  { %749 = shalt.err (!%p746_p8)
}
 0x3e2   :  { %s750_s24 = scalar_lea.hbm %s958_s9, 16 }
 0x3e3   :  { %p751_p9 = scmp.ne.s32.totalorder %s958_s9, %s750_s24  ;;  %p754_p10 = scmp.lt.u32.totalorder %s750_s24, %s958_s9 }
 0x3e5   :  { %p756_p11 = pnand %p754_p10, %p751_p9 }
 0x3e7   :  { %759 = shalt.err (!%p756_p11)
}
 0x3e8   :  { %s780_s10 = smov 16   ;;  %s781_s13 = smov 1  }
 0x3e9   :  { %517 = dma.vmem_to_hbm [thread:$0]  %s512_s8, 16, %s958_s9, [#allocation4], %s780_s10, %s780_s10, %s781_s13  }
 0x3ea   :  { %766 = dma.done.wait [#allocation4], 128  }
 0x3eb   :  { %767 = vsyncadd [#allocation4], 4294967168 }
 0x3ec   :  { %521 = vsyncpa [#allocation3], 1 }
 0x3ed   :  { %522 = vsyncpa [#allocation6], 1 }
 0x3ee   :  { %523 = vsyncpa [#allocation9], 1 }
 0x3ef   :  { %524 = vsyncpa [#allocation4], 1 }

</bundles_post_ra>
